<compile_context>
chip_gen: v7x
topology: tpu7x:2x2x1
jax: 0.10.0
libtpu: 0.0.40
codegen_flags: <defaults>
</compile_context>

<pallas_src>
import functools

import jax
import jax.numpy as jnp
from jax.experimental import pallas as pl
from jax.experimental.pallas import tpu as pltpu

LN_EPS = 1e-12  # Encoder: self.norm = LayerNorm(layer.size, eps=1e-12)


def _round_up(n, m):
    return ((n + m - 1) // m) * m


def layernorm_kernel(x_ref, gamma_ref, beta_ref, o_ref):
    # TF-style LayerNorm over the last dim; f32 elementwise math (v5e VPU has no bf16).
    x = x_ref[...].astype(jnp.float32)
    mean = jnp.mean(x, axis=-1, keepdims=True)
    centered = x - mean
    var = jnp.mean(centered * centered, axis=-1, keepdims=True)
    y = centered / jnp.sqrt(var + LN_EPS)
    o_ref[...] = (gamma_ref[...] * y + beta_ref[...]).astype(o_ref.dtype)


@functools.partial(jax.jit, static_argnames=("tile_m",))
def layernorm_forward(x, gamma, beta, tile_m=256):
    """x: [B, T, H] -> [B, T, H], TF-style LayerNorm over H."""
    B, T, H = x.shape
    M = B * T
    x2d = x.reshape(M, H)

    # Perf feedback: large row tiles (256) for HBM-roofline efficiency; shrink only for
    # tiny inputs, and pad the row count instead of asserting divisibility so arbitrary
    # B*T keep the large-tile plan.  Padded (all-zero) rows are finite under eps=1e-12
    # and are sliced off afterwards.
    tile = min(tile_m, _round_up(M, 8))
    m_pad = _round_up(M, tile)
    if m_pad != M:
        x2d = jnp.pad(x2d, ((0, m_pad - M), (0, 0)))
    grid = m_pad // tile

    gamma2d = gamma.reshape(1, H).astype(jnp.float32)
    beta2d = beta.reshape(1, H).astype(jnp.float32)

    itemsize = jnp.dtype(x.dtype).itemsize
    cost = pl.CostEstimate(
        flops=7 * m_pad * H,                                   # mean/var/normalize/affine
        transcendentals=m_pad,                                 # one sqrt per row
        bytes_accessed=2 * m_pad * H * itemsize + 2 * H * 4,   # x in + out + gamma/beta
    )

    out2d = pl.pallas_call(
        layernorm_kernel,
        out_shape=jax.ShapeDtypeStruct((m_pad, H), x.dtype),
        grid_spec=pltpu.PrefetchScalarGridSpec(
            num_scalar_prefetch=0,
            grid=(grid,),
            in_specs=[
                pl.BlockSpec((tile, H), lambda i: (i, 0)),  # x rows (lane-dense: full H)
                pl.BlockSpec((1, H), lambda i: (0, 0)),     # gamma (resident across grid)
                pl.BlockSpec((1, H), lambda i: (0, 0)),     # beta  (resident across grid)
            ],
            out_specs=pl.BlockSpec((tile, H), lambda i: (i, 0)),
        ),
        compiler_params=pltpu.CompilerParams(
            dimension_semantics=("parallel",),  # row tiles shard across TCs (v7x megacore)
        ),
        cost_estimate=cost,
    )(x2d, gamma2d, beta2d)
    return out2d[:M].reshape(B, T, H)


def encoder_forward(x, gamma, beta, mask=None, concept=None, lambd=5.0, tile_m=256):
    """Pallas equivalent of Encoder.forward."""
    # TODO(synk): the N cloned encoder layers (`self.layers`) use a generic `layer`
    # module whose class is not defined in the spec, so the layer stack (and its
    # mask/concept/lambd arguments) is a pass-through here; only the final TF-style
    # LayerNorm (`self.norm`, eps=1e-12) is implemented as a Pallas kernel.
    del mask, concept, lambd
    return layernorm_forward(x, gamma, beta, tile_m=tile_m)


if __name__ == "__main__":
    key = jax.random.PRNGKey(0)
    hidden_size = 32
    B, T = 2, 8

    kx, kg, kb = jax.random.split(key, 3)
    x = jax.random.normal(kx, (B, T, hidden_size), jnp.float32)
    # Module inits gamma=1, beta=0; perturb them so the check exercises the affine part.
    gamma = 1.0 + 0.1 * jax.random.normal(kg, (hidden_size,), jnp.float32)
    beta = 0.1 * jax.random.normal(kb, (hidden_size,), jnp.float32)

    out = encoder_forward(x, gamma, beta)
    out = jax.block_until_ready(out)

    # pure-JAX reference (TF-style LayerNorm, epsilon inside the square root)
    mean = x.mean(-1, keepdims=True)
    var = ((x - mean) ** 2).mean(-1, keepdims=True)
    ref = gamma * (x - mean) / jnp.sqrt(var + LN_EPS) + beta

    assert out.shape == (B, T, hidden_size)
    assert jnp.allclose(out, ref, atol=1e-5, rtol=1e-5)

    print("KERNEL_OK")
</pallas_src>

<mosaic_0001>
module attributes {stable_mosaic.version = 11 : i64} {
  func.func @layernorm_kernel(%arg0: i32, %arg1: memref<16x32xf32, #tpu.memory_space<vmem>>, %arg2: memref<1x32xf32, #tpu.memory_space<vmem>>, %arg3: memref<1x32xf32, #tpu.memory_space<vmem>>, %arg4: memref<16x32xf32, #tpu.memory_space<vmem>>) attributes {dimension_semantics = [#tpu.dimension_semantics<parallel>], iteration_bounds = array<i64: 1>, scalar_prefetch = 0 : i64, scratch_operands = 0 : i64, tpu.core_type = #tpu.core_type<tc>, window_params = [{transform_indices = @transform_0, window_bounds = array<i64: 16, 32>}, {pipeline_mode = #tpu.pipeline_mode<synchronous>, transform_indices = @transform_1, window_bounds = array<i64: 1, 32>}, {pipeline_mode = #tpu.pipeline_mode<synchronous>, transform_indices = @transform_2, window_bounds = array<i64: 1, 32>}, {transform_indices = @transform_3, window_bounds = array<i64: 16, 32>}]} {
    %c0 = arith.constant 0 : index
    %c0_0 = arith.constant 0 : index
    %0 = vector.load %arg1[%c0, %c0_0] : memref<16x32xf32, #tpu.memory_space<vmem>>, vector<16x32xf32>
    %cst = arith.constant dense<0.000000e+00> : vector<16xf32>
    %1 = vector.multi_reduction <add>, %0, %cst [1] : vector<16x32xf32> to vector<16xf32>
    %2 = vector.shape_cast %1 : vector<16xf32> to vector<16x1xf32>
    %cst_1 = arith.constant 3.200000e+01 : f32
    %3 = vector.broadcast %cst_1 : f32 to vector<16x1xf32>
    %4 = arith.divf %2, %3 : vector<16x1xf32>
    %5 = vector.broadcast %4 : vector<16x1xf32> to vector<16x32xf32>
    %6 = arith.subf %0, %5 : vector<16x32xf32>
    %7 = arith.mulf %6, %6 : vector<16x32xf32>
    %cst_2 = arith.constant dense<0.000000e+00> : vector<16xf32>
    %8 = vector.multi_reduction <add>, %7, %cst_2 [1] : vector<16x32xf32> to vector<16xf32>
    %9 = vector.shape_cast %8 : vector<16xf32> to vector<16x1xf32>
    %cst_3 = arith.constant 3.200000e+01 : f32
    %10 = vector.broadcast %cst_3 : f32 to vector<16x1xf32>
    %11 = arith.divf %9, %10 : vector<16x1xf32>
    %cst_4 = arith.constant 9.99999996E-13 : f32
    %12 = vector.broadcast %cst_4 : f32 to vector<16x1xf32>
    %13 = arith.addf %11, %12 : vector<16x1xf32>
    %14 = math.sqrt %13 : vector<16x1xf32>
    %15 = vector.broadcast %14 : vector<16x1xf32> to vector<16x32xf32>
    %16 = arith.divf %6, %15 : vector<16x32xf32>
    %c0_5 = arith.constant 0 : index
    %c0_6 = arith.constant 0 : index
    %17 = vector.load %arg2[%c0_5, %c0_6] : memref<1x32xf32, #tpu.memory_space<vmem>>, vector<1x32xf32>
    %18 = vector.broadcast %17 : vector<1x32xf32> to vector<16x32xf32>
    %19 = arith.mulf %18, %16 : vector<16x32xf32>
    %c0_7 = arith.constant 0 : index
    %c0_8 = arith.constant 0 : index
    %20 = vector.load %arg3[%c0_7, %c0_8] : memref<1x32xf32, #tpu.memory_space<vmem>>, vector<1x32xf32>
    %21 = vector.broadcast %20 : vector<1x32xf32> to vector<16x32xf32>
    %22 = arith.addf %19, %21 : vector<16x32xf32>
    %c0_9 = arith.constant 0 : index
    %c0_10 = arith.constant 0 : index
    %23 = vector.load %arg4[%c0_9, %c0_10] : memref<16x32xf32, #tpu.memory_space<vmem>>, vector<16x32xf32>
    tpu.vector_store %arg4[%c0_9, %c0_10], %22 {strides = array<i32>} : memref<16x32xf32, #tpu.memory_space<vmem>>, vector<16x32xf32>,
    return
  }
  func.func @transform_0(%arg0: i32) -> (i32, i32) {
    %c0_i32 = arith.constant 0 : i32
    %c0_i32_0 = arith.constant 0 : i32
    return %arg0, %c0_i32 : i32, i32
  }
  func.func @transform_1(%arg0: i32) -> (i32, i32) {
    %c0_i32 = arith.constant 0 : i32
    %c0_i32_0 = arith.constant 0 : i32
    %c0_i32_1 = arith.constant 0 : i32
    return %c0_i32, %c0_i32_0 : i32, i32
  }
  func.func @transform_2(%arg0: i32) -> (i32, i32) {
    %c0_i32 = arith.constant 0 : i32
    %c0_i32_0 = arith.constant 0 : i32
    %c0_i32_1 = arith.constant 0 : i32
    return %c0_i32, %c0_i32_0 : i32, i32
  }
  func.func @transform_3(%arg0: i32) -> (i32, i32) {
    %c0_i32 = arith.constant 0 : i32
    %c0_i32_0 = arith.constant 0 : i32
    return %arg0, %c0_i32 : i32, i32
  }
}

</mosaic_0001>

<bundles_post_ra>
// kernel: layernorm_forward.1
= control target key start
LH: loop header
LB: loop body
LE: loop exit
PB: predicated region body
PF: predicated region fallthrough
CT: control target
= control target key end

     0   :  { %8 = vsyncpa [#allocation3], 0  ;;  %s238_s0 = inlined_call_operand.hbm [shape: f32[16,32], index: 0, kind: input, shape index: {}]   ;;  %s239_s1 = inlined_call_operand.vmem [shape: f32[1,32], index: 1, kind: input, shape index: {}]   ;;  %s240_s2 = inlined_call_operand.vmem [shape: f32[1,32], index: 2, kind: input, shape index: {}]   ;;  %s241_s3 = inlined_call_operand.hbm [shape: f32[16,32], index: 3, kind: output, shape index: {}]  }
   0x1   :  { %9 = vsyncpa [#allocation4], 0  ;;  %s172_s12 = smov [#allocation2]   ;;  %s124_s16 = scalar_lea.hbm %s238_s0, 256 }
   0x2   :  { %s15_s13 = sshll.u32 %s172_s12, 4  ;;  %p125_p0 = scmp.ne.s32.totalorder %s238_s0, %s124_s16  ;;  %s16_s13 = int_to_ptr.vmem [resolvable:$true] %s15_s13 }
   0x3   :  { %p128_p1 = scmp.lt.u32.totalorder %s124_s16, %s238_s0 }
   0x5   :  { %p130_p2 = pnand %p128_p1, %p125_p0 }
   0x7   :  { %133 = shalt.err (!%p130_p2)
}
   0x8   :  { %s134_s21 = scalar_lea.vmem %s16_s13, 256  ;;  %p139_p4 = scmp.lt.s32.totalorder %s16_s13, %s16_s13 }
   0x9   :  { %p135_p3 = scmp.ne.s32.totalorder %s16_s13, %s134_s21  ;;  %p140_p5 = scmp.lt.s32.totalorder %s134_s21, %s134_s21 }
   0xb   :  { %p141_p6 = por %p140_p5, %p139_p4 }
   0xd   :  { %p142_p7 = pnand %p141_p6, %p135_p3 }
   0xf   :  { %145 = shalt.err (!%p142_p7)
}
  0x10   :  { %s173_s22 = smov 128   ;;  %s174_s23 = smov 8  }
  0x11   :  { %21 = dma.hbm_to_vmem [thread:$0]  %s238_s0, 256, %s16_s13, [#allocation3], %s173_s22, %s173_s22, %s174_s23  }
  0x12   :  { %168 = dma.done.wait [#allocation3], 256  }
  0x13   :  { %169 = vsyncadd [#allocation3], 4294967040  ;;  %vm31_vm0 = vcmask 261120   ;;  %v29_v0 = vld [vmem:[#allocation2] sm:$0xff]  ;;  %v30_v1 = vld [vmem:[#allocation2 + $0x8] sm:$0xff]  ;;  %s175_s29 = smov [#allocation5]  }
  0x14   :  { %v32_v2 = vsel %vm31_vm0, %v29_v0, 0.0  ;;  %v35_v3 = vsel %vm31_vm0, %v30_v1, 0.0  ;;  %v110_v31 = vld [vmem:[%s239_s1] ss:$0 sm:$0xff]  ;;  %s98_s30 = sshll.u32 %s175_s29, 4  ;;  %s99_s30 = int_to_ptr.vmem [resolvable:$true] %s98_s30 }
  0x15   :  { %33 = vadd.xlane.f32.xlu0 %v32_v2  ;;  %v111_v33 = vld [vmem:[%s240_s2] ss:$0 sm:$0xff]  ;;  %s146_s4 = scalar_lea.vmem %s99_s30, 256  ;;  %p151_p9 = scmp.lt.s32.totalorder %s99_s30, %s99_s30 }
  0x16   :  { %p147_p8 = scmp.ne.s32.totalorder %s99_s30, %s146_s4  ;;  %p152_p10 = scmp.lt.s32.totalorder %s146_s4, %s146_s4 }
  0x18   :  { %p153_p11 = por %p152_p10, %p151_p9 }
  0x19   :  { %36 = vadd.xlane.f32.xlu0 %v35_v3 }
  0x1a   :  { %p154_p12 = pnand %p153_p11, %p147_p8 }
  0xa2   :  { %v34_v4 = vpop.xlane.xlu0 %33 }
  0xa3   :  { %v39_v5 = vmul.f32 0.03125, %v34_v4 }
  0xa5   :  { %v41_v6 = vsub.f32 %v29_v0, %v39_v5 }
  0xa6   :  { %v37_v7 = vpop.xlane.xlu0 %36 }
  0xa7   :  { %v40_v8 = vmul.f32 0.03125, %v37_v7  ;;  %v43_v9 = vmul.f32 %v41_v6, %v41_v6 }
  0xa9   :  { %v42_v10 = vsub.f32 %v30_v1, %v40_v8  ;;  %v45_v11 = vsel %vm31_vm0, %v43_v9, 0.0 }
  0xaa   :  { %46 = vadd.xlane.f32.xlu1 %v45_v11 }
  0xab   :  { %v44_v12 = vmul.f32 %v42_v10, %v42_v10 }
  0xad   :  { %v48_v13 = vsel %vm31_vm0, %v44_v12, 0.0 }
  0xae   :  { %49 = vadd.xlane.f32.xlu1 %v48_v13 }
 0x137   :  { %v47_v14 = vpop.xlane.xlu1 %46 }
 0x138   :  { %v51_v15 = vmul.f32 0.03125, %v47_v14 }
 0x13a   :  { %v53_v16 = vadd.f32 1e-12, %v51_v15 }
 0x13b   :  { %v50_v17 = vpop.xlane.xlu1 %49 }
 0x13c   :  { %116 = vrsqrt.f32 %v53_v16  ;;  %v52_v18 = vmul.f32 0.03125, %v50_v17  ;;  %vm57_vm1 = vcmp.eq.f32.partialorder %v53_v16, inf  ;;  %v60_v22 = vand.u32 2147483648, %v53_v16 }
 0x13d   :  { %vm59_vm2 = vcmp.eq.f32.partialorder %v53_v16, 0.0 }
 0x13e   :  { %v54_v19 = vadd.f32 1e-12, %v52_v18 }
 0x140   :  { %118 = vrsqrt.f32 %v54_v19  ;;  %vm64_vm3 = vcmp.eq.f32.partialorder %v54_v19, inf  ;;  %v67_v27 = vand.u32 2147483648, %v54_v19  ;;  %vm66_vm4 = vcmp.eq.f32.partialorder %v54_v19, 0.0 }
 0x146   :  { %v117_v20 = vpop.eup %116 }
 0x147   :  { %v56_v21 = vmul.f32 %v117_v20, %v53_v16 }
 0x149   :  { %v58_v23 = vsel %vm57_vm1, %v53_v16, %v56_v21 }
 0x14a   :  { %v61_v24 = vsel %vm59_vm2, %v60_v22, %v58_v23  ;;  %v119_v25 = vpop.eup %118 }
 0x14b   :  { %120 = vrcp.f32 %v61_v24  ;;  %v63_v26 = vmul.f32 %v119_v25, %v54_v19 }
 0x14d   :  { %v65_v28 = vsel %vm64_vm3, %v54_v19, %v63_v26 }
 0x14e   :  { %v68_v29 = vsel %vm66_vm4, %v67_v27, %v65_v28 }
 0x14f   :  { %122 = vrcp.f32 %v68_v29 }
 0x155   :  { %v121_v30 = vpop.eup %120 }
 0x156   :  { %v70_v32 = vmul.f32 %v121_v30, %v41_v6 }
 0x158   :  { %v80_v34 = vmul.f32 %v110_v31, %v70_v32 }
 0x159   :  { %v123_v35 = vpop.eup %122 }
 0x15a   :  { %v89_v36 = vadd.f32 %v111_v33, %v80_v34  ;;  %v72_v37 = vmul.f32 %v123_v35, %v42_v10 }
 0x15c   :  { %91 = vst.msk [vmem:[#allocation5] sm:$0xff] %vm31_vm0, %v89_v36  ;;  %v81_v38 = vmul.f32 %v110_v31, %v72_v37 }
 0x15e   :  { %v90_v39 = vadd.f32 %v111_v33, %v81_v38 }
 0x160   :  { %92 = vst.msk [vmem:[#allocation5 + $0x8] sm:$0xff] %vm31_vm0, %v90_v39 }
 0x161   :  { %157 = shalt.err (!%p154_p12)
}
 0x162   :  { %s158_s5 = scalar_lea.hbm %s241_s3, 256 }
 0x163   :  { %p159_p13 = scmp.ne.s32.totalorder %s241_s3, %s158_s5  ;;  %p162_p0 = scmp.lt.u32.totalorder %s158_s5, %s241_s3 }
 0x165   :  { %p164_p1 = pnand %p162_p0, %p159_p13 }
 0x167   :  { %167 = shalt.err (!%p164_p1)
}
 0x168   :  { %104 = dma.vmem_to_hbm [thread:$0]  %s99_s30, 256, %s241_s3, [#allocation4], %s173_s22, %s173_s22, %s174_s23  }
 0x169   :  { %170 = dma.done.wait [#allocation4], 256  }
 0x16a   :  { %171 = vsyncadd [#allocation4], 4294967040 }
 0x16b   :  { %108 = vsyncpa [#allocation3], 1 }
 0x16c   :  { %109 = vsyncpa [#allocation4], 1 }

</bundles_post_ra>
